<compile_context>
chip_gen: v7x
topology: tpu7x:2x2x1
jax: 0.10.0
libtpu: 0.0.40
codegen_flags: <defaults>
</compile_context>

<pallas_src>
import functools

import numpy as np
import jax
import jax.numpy as jnp
from jax.experimental import pallas as pl
from jax.experimental.pallas import tpu as pltpu

COST_CLASS = 1.0
COST_BBOX = 5.0
COST_GIOU = 2.0

_MiB = 1024 * 1024


def _round_up(x, m):
    return ((x + m - 1) // m) * m


def _cdiv(a, b):
    return -(-a // b)


# ----------------------------------------------------------------------------
# Pallas kernel: one row-tile of the cost matrix
#   C = 5 * L1(boxes) + 1 * (-softmax gather) + 2 * (-GIoU)
# ----------------------------------------------------------------------------
def cost_matrix_kernel(logits_ref, boxes_ref, tgt_ref, onehot_ref, c_ref, *, z_col):
    # ---- class cost: softmax gather via one-hot matmul ----------------------
    # The softmax denominator comes "for free" out of the MXU: column `z_col`
    # of `onehot` is all ones over the valid classes, so eg[:, z_col] == sum(e).
    logits = logits_ref[...].astype(jnp.float32)                 # [tn, Cp]
    m = jnp.max(logits, axis=-1, keepdims=True)                  # [tn, 1]  (XLU)
    e = jnp.exp(logits - m)                                      # [tn, Cp] (EUP)
    eg = jnp.dot(e, onehot_ref[...],
                 preferred_element_type=jnp.float32)             # [tn, Tp] (MXU)
    z = eg[:, z_col:z_col + 1]                                   # [tn, 1]  softmax denom
    cost_class = -(eg * (1.0 / z))                               # exact divide, [tn,1] only

    # ---- per-query box quantities -------------------------------------------
    ob = boxes_ref[...].astype(jnp.float32)                      # [tn, 4]  cxcywh
    ocx, ocy, ow, oh = ob[:, 0:1], ob[:, 1:2], ob[:, 2:3], ob[:, 3:4]

    # ---- per-target constants (precomputed in the wrapper) ------------------
    tgt = tgt_ref[...]                                           # [16, Tp]
    tcx, tcy = tgt[0:1, :], tgt[1:2, :]
    tw, th = tgt[2:3, :], tgt[3:4, :]
    tx1, ty1 = tgt[4:5, :], tgt[5:6, :]
    tx2, ty2 = tgt[6:7, :], tgt[7:8, :]
    area2 = tgt[8:9, :]

    # ---- L1 cdist (p=1) ------------------------------------------------------
    cost_bbox = jnp.abs(ocx - tcx)
    cost_bbox = cost_bbox + jnp.abs(ocy - tcy)
    cost_bbox = cost_bbox + jnp.abs(ow - tw)
    cost_bbox = cost_bbox + jnp.abs(oh - th)                     # [tn, Tp]

    # ---- GIoU cost -----------------------------------------------------------
    ox1, oy1 = ocx - 0.5 * ow, ocy - 0.5 * oh
    ox2, oy2 = ocx + 0.5 * ow, ocy + 0.5 * oh
    area1 = (ox2 - ox1) * (oy2 - oy1)                            # [tn, 1]

    iw = jnp.maximum(jnp.minimum(ox2, tx2) - jnp.maximum(ox1, tx1), 0.0)
    ih = jnp.maximum(jnp.minimum(oy2, ty2) - jnp.maximum(oy1, ty1), 0.0)
    inter = iw * ih                                              # [tn, Tp]
    union = area1 + area2 - inter                                # [tn, Tp]

    # Enclosing box extents are always >= 0 for valid boxes: no clamp needed.
    ew = jnp.maximum(ox2, tx2) - jnp.minimum(ox1, tx1)
    eh = jnp.maximum(oy2, ty2) - jnp.minimum(oy1, ty1)
    enclose = ew * eh

    # giou = inter/union - (enclose-union)/enclose, over a common denominator
    # (one exact divide instead of two).
    giou = (inter * enclose - (enclose - union) * union) / (union * enclose)

    c_ref[...] = COST_BBOX * cost_bbox + COST_CLASS * cost_class - COST_GIOU * giou


# ----------------------------------------------------------------------------
# Tiling / VMEM budgeting
# ----------------------------------------------------------------------------
def _pick_tiling(N, C_pad, T_pad, in_itemsize):
    try:
        vmem_cap = int(pltpu.get_tpu_info().vmem_capacity_bytes)
    except Exception:
        vmem_cap = 64 * _MiB  # conservative: assume v7x-sized VMEM

    # Scoped VMEM limit: <= 48 MiB on v7x (64 MiB physical), <= 64 MiB otherwise.
    vmem_limit = int(min(max(vmem_cap - 16 * _MiB, 32 * _MiB), 64 * _MiB))
    budget = vmem_limit - 16 * _MiB  # headroom for compiler scratch / semaphores

    # Grid-invariant resident operands (double-buffered by the pipeline):
    # one-hot [C_pad, T_pad] f32 + target features [16, T_pad] f32.
    resident = 2 * (C_pad + 16) * T_pad * 4
    row_budget = max(budget - resident, 2 * _MiB)

    # Per-row VMEM cost:
    #  * double-buffered DMA blocks: logits (native dtype), boxes lane-padded
    #    to 128 lanes, output row of T_pad f32,
    #  * single-copy f32 compute temporaries: logits/e upcasts (~2*C_pad f32)
    #    and ~6 live [*, T_pad] f32 intermediates in the class/L1/GIoU math.
    per_row = (2 * (in_itemsize * C_pad + 128 * 4 + T_pad * 4)
               + 2 * C_pad * 4 + 6 * T_pad * 4)

    tile_cap = 2048 if vmem_cap > 96 * _MiB else 1024
    tile_n_max = max(8, min(tile_cap, (row_budget // per_row) // 8 * 8))

    # Grid shaping: at least 2 steps (pipeline overlap + v7x megacore), even
    # step count, tile_n ~= N/num_steps so row padding stays small.
    num_steps = max(2, _cdiv(N, tile_n_max))
    if num_steps % 2:
        num_steps += 1
    tile_n = max(8, _round_up(_cdiv(N, num_steps), 8))
    N_pad = num_steps * tile_n
    return tile_n, num_steps, N_pad, vmem_limit


# ----------------------------------------------------------------------------
# Wrapper: builds padded operands and calls the kernel
# ----------------------------------------------------------------------------
def compute_cost_matrix(pred_logits, pred_boxes, tgt_ids, tgt_bbox):
    """pred_logits: [bs, Q, C]; pred_boxes: [bs, Q, 4]; tgt_ids: [T]; tgt_bbox: [T, 4]."""
    bs, Q, C = pred_logits.shape
    N = bs * Q
    T = int(tgt_bbox.shape[0])

    in_dtype = pred_logits.dtype
    in_itemsize = jnp.dtype(in_dtype).itemsize

    # Lane-dense padding; T_pad reserves one spare column for the softmax-sum.
    C_pad = _round_up(C, 128)
    T_pad = _round_up(T + 1, 128)
    z_col = T_pad - 1

    tile_n, num_steps, N_pad, vmem_limit = _pick_tiling(N, C_pad, T_pad, in_itemsize)

    # dtype-aware padding constant: exp(pad - m) == 0, no overflow even for fp16.
    neg_large = float(jnp.finfo(in_dtype).min) / 2.0

    # ---- logits: avoid the padded HBM copy when already aligned -------------
    logits2d = pred_logits.reshape(N, C)
    if N_pad == N and C_pad == C:
        pad_logits = logits2d
    else:
        pad_logits = jnp.pad(logits2d, ((0, N_pad - N), (0, C_pad - C)),
                             constant_values=neg_large)

    # ---- predicted boxes (padded rows use valid dummy boxes -> no NaN) ------
    dummy_box = jnp.array([0.5, 0.5, 1.0, 1.0], jnp.float32)
    boxes2d = pred_boxes.reshape(N, 4).astype(jnp.float32)
    if N_pad > N:
        boxes2d = jnp.concatenate(
            [boxes2d, jnp.broadcast_to(dummy_box, (N_pad - N, 4))], axis=0)

    # ---- per-target precomputed constants [16, T_pad] -----------------------
    tgt_cxcywh = jnp.tile(dummy_box[None, :], (T_pad, 1))
    if T > 0:
        tgt_cxcywh = tgt_cxcywh.at[:T, :].set(tgt_bbox.astype(jnp.float32))
    tcx, tcy = tgt_cxcywh[:, 0], tgt_cxcywh[:, 1]
    tw, th = tgt_cxcywh[:, 2], tgt_cxcywh[:, 3]
    tx1, ty1 = tcx - 0.5 * tw, tcy - 0.5 * th
    tx2, ty2 = tcx + 0.5 * tw, tcy + 0.5 * th
    area2 = (tx2 - tx1) * (ty2 - ty1)
    tgt_feat = jnp.zeros((16, T_pad), jnp.float32)
    tgt_feat = tgt_feat.at[0].set(tcx).at[1].set(tcy).at[2].set(tw).at[3].set(th)
    tgt_feat = tgt_feat.at[4].set(tx1).at[5].set(ty1).at[6].set(tx2).at[7].set(ty2)
    tgt_feat = tgt_feat.at[8].set(area2)

    # ---- one-hot class matrix [C_pad, T_pad]; last column = softmax sum -----
    onehot = jnp.zeros((C_pad, T_pad), jnp.float32)
    if T > 0:
        onehot = onehot.at[:C, :T].set(jax.nn.one_hot(tgt_ids, C, dtype=jnp.float32).T)
    onehot = onehot.at[:C, z_col].set(1.0)

    # TODO(synk): for very large target counts (T_pad >= 512) add a second
    # "parallel" grid axis over T to bound the [tile_n, T_pad] footprint; not
    # needed for typical DETR target counts.
    kernel = functools.partial(cost_matrix_kernel, z_col=z_col)
    grid = (num_steps,)
    cost = pl.pallas_call(
        kernel,
        out_shape=jax.ShapeDtypeStruct((N_pad, T_pad), jnp.float32),
        grid_spec=pltpu.PrefetchScalarGridSpec(
            num_scalar_prefetch=0,
            grid=grid,
            in_specs=[
                pl.BlockSpec((tile_n, C_pad), lambda i: (i, 0)),
                pl.BlockSpec((tile_n, 4), lambda i: (i, 0)),
                pl.BlockSpec((16, T_pad), lambda i: (0, 0)),
                pl.BlockSpec((C_pad, T_pad), lambda i: (0, 0)),
            ],
            out_specs=pl.BlockSpec((tile_n, T_pad), lambda i: (i, 0)),
        ),
        compiler_params=pltpu.CompilerParams(
            dimension_semantics=("parallel",),
            vmem_limit_bytes=vmem_limit,
        ),
        cost_estimate=pl.CostEstimate(
            flops=2 * N_pad * C_pad * T_pad + 30 * N_pad * T_pad,
            transcendentals=N_pad * C_pad,
            bytes_accessed=(N_pad * C_pad * in_itemsize
                            + N_pad * 4 * 4
                            + 16 * T_pad * 4
                            + C_pad * T_pad * 4
                            + N_pad * T_pad * 4),
        ),
    )(pad_logits, boxes2d, tgt_feat, onehot)

    return cost[:N, :T].reshape(bs, Q, T)


# ----------------------------------------------------------------------------
# Host-side Hungarian algorithm (Jonker-Volgenant / e-maxx potentials).
# TODO(synk): linear_sum_assignment is sequential/combinatorial -> no Pallas equivalent.
# ----------------------------------------------------------------------------
def linear_sum_assignment_np(cost):
    cost = np.asarray(cost, dtype=np.float64)
    transposed = False
    if cost.shape[0] > cost.shape[1]:
        cost = cost.T
        transposed = True
    n, m = cost.shape  # n <= m
    u = np.zeros(n + 1)
    v = np.zeros(m + 1)
    p = np.zeros(m + 1, dtype=np.int64)
    way = np.zeros(m + 1, dtype=np.int64)
    for i in range(1, n + 1):
        p[0] = i
        j0 = 0
        minv = np.full(m + 1, np.inf)
        used = np.zeros(m + 1, dtype=bool)
        while True:
            used[j0] = True
            i0 = p[j0]
            delta = np.inf
            j1 = -1
            for j in range(1, m + 1):
                if not used[j]:
                    cur = cost[i0 - 1, j - 1] - u[i0] - v[j]
                    if cur < minv[j]:
                        minv[j] = cur
                        way[j] = j0
                    if minv[j] < delta:
                        delta = minv[j]
                        j1 = j
            for j in range(m + 1):
                if used[j]:
                    u[p[j]] += delta
                    v[j] -= delta
                else:
                    minv[j] -= delta
            j0 = j1
            if p[j0] == 0:
                break
        while True:
            j1 = way[j0]
            p[j0] = p[j1]
            j0 = j1
            if j0 == 0:
                break
    rows, cols = [], []
    for j in range(1, m + 1):
        if p[j] != 0:
            rows.append(p[j] - 1)
            cols.append(j - 1)
    rows = np.asarray(rows, dtype=np.int64)
    cols = np.asarray(cols, dtype=np.int64)
    if transposed:
        rows, cols = cols, rows
    order = np.argsort(rows)
    return rows[order], cols[order]


# ----------------------------------------------------------------------------
# Full HungarianMatcher forward
# ----------------------------------------------------------------------------
def hungarian_matcher_forward(outputs, targets):
    bs, Q, _ = outputs["pred_logits"].shape
    tgt_ids = jnp.concatenate([t["labels"] for t in targets])
    tgt_bbox = jnp.concatenate([t["boxes"] for t in targets])
    C = compute_cost_matrix(outputs["pred_logits"], outputs["pred_boxes"], tgt_ids, tgt_bbox)
    C = np.asarray(jax.block_until_ready(C))                     # [bs, Q, sum(sizes)]
    sizes = [int(t["boxes"].shape[0]) for t in targets]
    splits = np.split(C, np.cumsum(sizes)[:-1], axis=-1)
    indices = []
    for b, cost_of_each_batch in enumerate(splits):
        i, j = linear_sum_assignment_np(cost_of_each_batch[b])
        # int32 on device (int64 would require jax_enable_x64); values identical.
        indices.append((jnp.asarray(i, dtype=jnp.int32), jnp.asarray(j, dtype=jnp.int32)))
    return indices


# ----------------------------------------------------------------------------
# Pure-JAX reference of the cost matrix (for correctness check)
# ----------------------------------------------------------------------------
def reference_cost_matrix(pred_logits, pred_boxes, tgt_ids, tgt_bbox):
    bs, Q, Cc = pred_logits.shape
    out_prob = jax.nn.softmax(pred_logits.reshape(-1, Cc).astype(jnp.float32), axis=-1)
    out_bbox = pred_boxes.reshape(-1, 4).astype(jnp.float32)
    cost_class = -out_prob[:, tgt_ids]
    cost_bbox = jnp.sum(jnp.abs(out_bbox[:, None, :] - tgt_bbox[None, :, :]), axis=-1)

    def cxcy_to_xy(b):
        return jnp.concatenate([b[..., :2] - 0.5 * b[..., 2:], b[..., :2] + 0.5 * b[..., 2:]], -1)

    b1 = cxcy_to_xy(out_bbox)
    b2 = cxcy_to_xy(tgt_bbox)
    area1 = (b1[:, 2] - b1[:, 0]) * (b1[:, 3] - b1[:, 1])
    area2 = (b2[:, 2] - b2[:, 0]) * (b2[:, 3] - b2[:, 1])
    lt = jnp.maximum(b1[:, None, :2], b2[None, :, :2])
    rb = jnp.minimum(b1[:, None, 2:], b2[None, :, 2:])
    wh = jnp.clip(rb - lt, 0.0)
    inter = wh[..., 0] * wh[..., 1]
    union = area1[:, None] + area2[None, :] - inter
    iou = inter / union
    lt_e = jnp.minimum(b1[:, None, :2], b2[None, :, :2])
    rb_e = jnp.maximum(b1[:, None, 2:], b2[None, :, 2:])
    wh_e = jnp.clip(rb_e - lt_e, 0.0)
    enclose = wh_e[..., 0] * wh_e[..., 1]
    giou = iou - (enclose - union) / enclose
    C = COST_BBOX * cost_bbox + COST_CLASS * cost_class + COST_GIOU * (-giou)
    return C.reshape(bs, Q, -1)


if __name__ == "__main__":
    bs, num_queries, num_classes = 2, 8, 32
    sizes = [3, 4]  # number of GT boxes per batch element

    key = jax.random.PRNGKey(0)
    k_logits, k_boxes, k_lab, k_tb = jax.random.split(key, 4)

    pred_logits = jax.random.normal(k_logits, (bs, num_queries, num_classes), jnp.float32)
    # predicted boxes: valid cxcywh in (0, 1)
    pb = jax.random.uniform(k_boxes, (bs, num_queries, 4), jnp.float32)
    pred_boxes = jnp.concatenate([0.3 + 0.4 * pb[..., :2], 0.1 + 0.3 * pb[..., 2:]], axis=-1)

    targets = []
    lab_keys = jax.random.split(k_lab, bs)
    box_keys = jax.random.split(k_tb, bs)
    for b in range(bs):
        labels = jax.random.randint(lab_keys[b], (sizes[b],), 0, num_classes, jnp.int32)
        tb = jax.random.uniform(box_keys[b], (sizes[b], 4), jnp.float32)
        boxes = jnp.concatenate([0.3 + 0.4 * tb[..., :2], 0.1 + 0.3 * tb[..., 2:]], axis=-1)
        targets.append({"labels": labels, "boxes": boxes})

    outputs = {"pred_logits": pred_logits, "pred_boxes": pred_boxes}

    # correctness check of the Pallas cost matrix against the pure-JAX reference
    tgt_ids_all = jnp.concatenate([t["labels"] for t in targets])
    tgt_bbox_all = jnp.concatenate([t["boxes"] for t in targets])
    c_kernel = jax.block_until_ready(
        compute_cost_matrix(pred_logits, pred_boxes, tgt_ids_all, tgt_bbox_all))
    c_ref = jax.block_until_ready(
        reference_cost_matrix(pred_logits, pred_boxes, tgt_ids_all, tgt_bbox_all))
    np.testing.assert_allclose(np.asarray(c_kernel), np.asarray(c_ref), rtol=1e-5, atol=1e-5)

    indices = hungarian_matcher_forward(outputs, targets)
    for b, (i, j) in enumerate(indices):
        assert i.shape[0] == j.shape[0] == min(num_queries, sizes[b])
    jax.block_until_ready(c_kernel)
    print("KERNEL_OK")
</pallas_src>

<mosaic_0001>
module attributes {stable_mosaic.version = 11 : i64} {
  func.func @cost_matrix_kernel(%arg0: i32, %arg1: memref<8x128xf32, #tpu.memory_space<vmem>>, %arg2: memref<8x4xf32, #tpu.memory_space<vmem>>, %arg3: memref<16x128xf32, #tpu.memory_space<vmem>>, %arg4: memref<128x128xf32, #tpu.memory_space<vmem>>, %arg5: memref<8x128xf32, #tpu.memory_space<vmem>>) attributes {dimension_semantics = [#tpu.dimension_semantics<parallel>], iteration_bounds = array<i64: 2>, scalar_prefetch = 0 : i64, scratch_operands = 0 : i64, tpu.core_type = #tpu.core_type<tc>, window_params = [{transform_indices = @transform_0, window_bounds = array<i64: 8, 128>}, {transform_indices = @transform_1, window_bounds = array<i64: 8, 4>}, {pipeline_mode = #tpu.pipeline_mode<synchronous>, transform_indices = @transform_2, window_bounds = array<i64: 16, 128>}, {pipeline_mode = #tpu.pipeline_mode<synchronous>, transform_indices = @transform_3, window_bounds = array<i64: 128, 128>}, {transform_indices = @transform_4, window_bounds = array<i64: 8, 128>}]} {
    %c0 = arith.constant 0 : index
    %c0_0 = arith.constant 0 : index
    %0 = vector.load %arg1[%c0, %c0_0] : memref<8x128xf32, #tpu.memory_space<vmem>>, vector<8x128xf32>
    %cst = arith.constant dense<0xFF800000> : vector<8xf32>
    %1 = vector.multi_reduction <maximumf>, %0, %cst [1] : vector<8x128xf32> to vector<8xf32>
    %2 = vector.shape_cast %1 : vector<8xf32> to vector<8x1xf32>
    %3 = vector.broadcast %2 : vector<8x1xf32> to vector<8x128xf32>
    %4 = arith.subf %0, %3 : vector<8x128xf32>
    %5 = math.exp %4 : vector<8x128xf32>
    %c0_1 = arith.constant 0 : index
    %c0_2 = arith.constant 0 : index
    %6 = vector.load %arg4[%c0_1, %c0_2] : memref<128x128xf32, #tpu.memory_space<vmem>>, vector<128x128xf32>
    %cst_3 = arith.constant dense<0.000000e+00> : vector<8x128xf32>
    %7 = tpu.matmul %5, %6, %cst_3 {dimension_numbers = #tpu.dot_dimension_numbers<[1], [0], [0], [1], [0, 0, 1, 1], [], []>} : vector<8x128xf32>, vector<128x128xf32>, vector<8x128xf32> -> vector<8x128xf32>
    %8 = vector.extract_strided_slice %7 {offsets = [0, 127], sizes = [8, 1], strides = [1, 1]} : vector<8x128xf32> to vector<8x1xf32>
    %cst_4 = arith.constant 1.000000e+00 : f32
    %9 = vector.broadcast %cst_4 : f32 to vector<8x1xf32>
    %10 = arith.divf %9, %8 : vector<8x1xf32>
    %11 = vector.broadcast %10 : vector<8x1xf32> to vector<8x128xf32>
    %12 = arith.mulf %7, %11 : vector<8x128xf32>
    %cst_5 = arith.constant 0.000000e+00 : f32
    %13 = vector.broadcast %cst_5 : f32 to vector<8x128xf32>
    %14 = arith.subf %13, %12 : vector<8x128xf32>
    %c0_6 = arith.constant 0 : index
    %c0_7 = arith.constant 0 : index
    %15 = vector.load %arg2[%c0_6, %c0_7] : memref<8x4xf32, #tpu.memory_space<vmem>>, vector<8x4xf32>
    %16 = vector.extract_strided_slice %15 {offsets = [0, 0], sizes = [8, 1], strides = [1, 1]} : vector<8x4xf32> to vector<8x1xf32>
    %17 = vector.extract_strided_slice %15 {offsets = [0, 1], sizes = [8, 1], strides = [1, 1]} : vector<8x4xf32> to vector<8x1xf32>
    %18 = vector.extract_strided_slice %15 {offsets = [0, 2], sizes = [8, 1], strides = [1, 1]} : vector<8x4xf32> to vector<8x1xf32>
    %19 = vector.extract_strided_slice %15 {offsets = [0, 3], sizes = [8, 1], strides = [1, 1]} : vector<8x4xf32> to vector<8x1xf32>
    %c0_8 = arith.constant 0 : index
    %c0_9 = arith.constant 0 : index
    %20 = vector.load %arg3[%c0_8, %c0_9] : memref<16x128xf32, #tpu.memory_space<vmem>>, vector<16x128xf32>
    %21 = vector.extract_strided_slice %20 {offsets = [0, 0], sizes = [1, 128], strides = [1, 1]} : vector<16x128xf32> to vector<1x128xf32>
    %22 = vector.extract_strided_slice %20 {offsets = [1, 0], sizes = [1, 128], strides = [1, 1]} : vector<16x128xf32> to vector<1x128xf32>
    %23 = vector.extract_strided_slice %20 {offsets = [2, 0], sizes = [1, 128], strides = [1, 1]} : vector<16x128xf32> to vector<1x128xf32>
    %24 = vector.extract_strided_slice %20 {offsets = [3, 0], sizes = [1, 128], strides = [1, 1]} : vector<16x128xf32> to vector<1x128xf32>
    %25 = vector.extract_strided_slice %20 {offsets = [4, 0], sizes = [1, 128], strides = [1, 1]} : vector<16x128xf32> to vector<1x128xf32>
    %26 = vector.extract_strided_slice %20 {offsets = [5, 0], sizes = [1, 128], strides = [1, 1]} : vector<16x128xf32> to vector<1x128xf32>
    %27 = vector.extract_strided_slice %20 {offsets = [6, 0], sizes = [1, 128], strides = [1, 1]} : vector<16x128xf32> to vector<1x128xf32>
    %28 = vector.extract_strided_slice %20 {offsets = [7, 0], sizes = [1, 128], strides = [1, 1]} : vector<16x128xf32> to vector<1x128xf32>
    %29 = vector.extract_strided_slice %20 {offsets = [8, 0], sizes = [1, 128], strides = [1, 1]} : vector<16x128xf32> to vector<1x128xf32>
    %30 = vector.broadcast %16 : vector<8x1xf32> to vector<8x128xf32>
    %31 = vector.broadcast %21 : vector<1x128xf32> to vector<8x128xf32>
    %32 = arith.subf %30, %31 : vector<8x128xf32>
    %33 = math.absf %32 : vector<8x128xf32>
    %34 = vector.broadcast %17 : vector<8x1xf32> to vector<8x128xf32>
    %35 = vector.broadcast %22 : vector<1x128xf32> to vector<8x128xf32>
    %36 = arith.subf %34, %35 : vector<8x128xf32>
    %37 = math.absf %36 : vector<8x128xf32>
    %38 = arith.addf %33, %37 : vector<8x128xf32>
    %39 = vector.broadcast %18 : vector<8x1xf32> to vector<8x128xf32>
    %40 = vector.broadcast %23 : vector<1x128xf32> to vector<8x128xf32>
    %41 = arith.subf %39, %40 : vector<8x128xf32>
    %42 = math.absf %41 : vector<8x128xf32>
    %43 = arith.addf %38, %42 : vector<8x128xf32>
    %44 = vector.broadcast %19 : vector<8x1xf32> to vector<8x128xf32>
    %45 = vector.broadcast %24 : vector<1x128xf32> to vector<8x128xf32>
    %46 = arith.subf %44, %45 : vector<8x128xf32>
    %47 = math.absf %46 : vector<8x128xf32>
    %48 = arith.addf %43, %47 : vector<8x128xf32>
    %cst_10 = arith.constant 5.000000e-01 : f32
    %49 = vector.broadcast %cst_10 : f32 to vector<8x1xf32>
    %50 = arith.mulf %49, %18 : vector<8x1xf32>
    %51 = arith.subf %16, %50 : vector<8x1xf32>
    %cst_11 = arith.constant 5.000000e-01 : f32
    %52 = vector.broadcast %cst_11 : f32 to vector<8x1xf32>
    %53 = arith.mulf %52, %19 : vector<8x1xf32>
    %54 = arith.subf %17, %53 : vector<8x1xf32>
    %cst_12 = arith.constant 5.000000e-01 : f32
    %55 = vector.broadcast %cst_12 : f32 to vector<8x1xf32>
    %56 = arith.mulf %55, %18 : vector<8x1xf32>
    %57 = arith.addf %16, %56 : vector<8x1xf32>
    %cst_13 = arith.constant 5.000000e-01 : f32
    %58 = vector.broadcast %cst_13 : f32 to vector<8x1xf32>
    %59 = arith.mulf %58, %19 : vector<8x1xf32>
    %60 = arith.addf %17, %59 : vector<8x1xf32>
    %61 = arith.subf %57, %51 : vector<8x1xf32>
    %62 = arith.subf %60, %54 : vector<8x1xf32>
    %63 = arith.mulf %61, %62 : vector<8x1xf32>
    %64 = vector.broadcast %57 : vector<8x1xf32> to vector<8x128xf32>
    %65 = vector.broadcast %27 : vector<1x128xf32> to vector<8x128xf32>
    %66 = arith.minimumf %64, %65 : vector<8x128xf32>
    %67 = vector.broadcast %51 : vector<8x1xf32> to vector<8x128xf32>
    %68 = vector.broadcast %25 : vector<1x128xf32> to vector<8x128xf32>
    %69 = arith.maximumf %67, %68 : vector<8x128xf32>
    %70 = arith.subf %66, %69 : vector<8x128xf32>
    %cst_14 = arith.constant 0.000000e+00 : f32
    %71 = vector.broadcast %cst_14 : f32 to vector<8x128xf32>
    %72 = arith.maximumf %70, %71 : vector<8x128xf32>
    %73 = vector.broadcast %60 : vector<8x1xf32> to vector<8x128xf32>
    %74 = vector.broadcast %28 : vector<1x128xf32> to vector<8x128xf32>
    %75 = arith.minimumf %73, %74 : vector<8x128xf32>
    %76 = vector.broadcast %54 : vector<8x1xf32> to vector<8x128xf32>
    %77 = vector.broadcast %26 : vector<1x128xf32> to vector<8x128xf32>
    %78 = arith.maximumf %76, %77 : vector<8x128xf32>
    %79 = arith.subf %75, %78 : vector<8x128xf32>
    %cst_15 = arith.constant 0.000000e+00 : f32
    %80 = vector.broadcast %cst_15 : f32 to vector<8x128xf32>
    %81 = arith.maximumf %79, %80 : vector<8x128xf32>
    %82 = arith.mulf %72, %81 : vector<8x128xf32>
    %83 = vector.broadcast %63 : vector<8x1xf32> to vector<8x128xf32>
    %84 = vector.broadcast %29 : vector<1x128xf32> to vector<8x128xf32>
    %85 = arith.addf %83, %84 : vector<8x128xf32>
    %86 = arith.subf %85, %82 : vector<8x128xf32>
    %87 = vector.broadcast %57 : vector<8x1xf32> to vector<8x128xf32>
    %88 = vector.broadcast %27 : vector<1x128xf32> to vector<8x128xf32>
    %89 = arith.maximumf %87, %88 : vector<8x128xf32>
    %90 = vector.broadcast %51 : vector<8x1xf32> to vector<8x128xf32>
    %91 = vector.broadcast %25 : vector<1x128xf32> to vector<8x128xf32>
    %92 = arith.minimumf %90, %91 : vector<8x128xf32>
    %93 = arith.subf %89, %92 : vector<8x128xf32>
    %94 = vector.broadcast %60 : vector<8x1xf32> to vector<8x128xf32>
    %95 = vector.broadcast %28 : vector<1x128xf32> to vector<8x128xf32>
    %96 = arith.maximumf %94, %95 : vector<8x128xf32>
    %97 = vector.broadcast %54 : vector<8x1xf32> to vector<8x128xf32>
    %98 = vector.broadcast %26 : vector<1x128xf32> to vector<8x128xf32>
    %99 = arith.minimumf %97, %98 : vector<8x128xf32>
    %100 = arith.subf %96, %99 : vector<8x128xf32>
    %101 = arith.mulf %93, %100 : vector<8x128xf32>
    %102 = arith.mulf %82, %101 : vector<8x128xf32>
    %103 = arith.subf %101, %86 : vector<8x128xf32>
    %104 = arith.mulf %103, %86 : vector<8x128xf32>
    %105 = arith.subf %102, %104 : vector<8x128xf32>
    %106 = arith.mulf %86, %101 : vector<8x128xf32>
    %107 = arith.divf %105, %106 : vector<8x128xf32>
    %cst_16 = arith.constant 5.000000e+00 : f32
    %108 = vector.broadcast %cst_16 : f32 to vector<8x128xf32>
    %109 = arith.mulf %108, %48 : vector<8x128xf32>
    %cst_17 = arith.constant 1.000000e+00 : f32
    %110 = vector.broadcast %cst_17 : f32 to vector<8x128xf32>
    %111 = arith.mulf %110, %14 : vector<8x128xf32>
    %112 = arith.addf %109, %111 : vector<8x128xf32>
    %cst_18 = arith.constant 2.000000e+00 : f32
    %113 = vector.broadcast %cst_18 : f32 to vector<8x128xf32>
    %114 = arith.mulf %113, %107 : vector<8x128xf32>
    %115 = arith.subf %112, %114 : vector<8x128xf32>
    %c0_19 = arith.constant 0 : index
    %c0_20 = arith.constant 0 : index
    %116 = vector.load %arg5[%c0_19, %c0_20] : memref<8x128xf32, #tpu.memory_space<vmem>>, vector<8x128xf32>
    tpu.vector_store %arg5[%c0_19, %c0_20], %115 {strides = array<i32>} : memref<8x128xf32, #tpu.memory_space<vmem>>, vector<8x128xf32>,
    return
  }
  func.func @transform_0(%arg0: i32) -> (i32, i32) {
    %c0_i32 = arith.constant 0 : i32
    %c0_i32_0 = arith.constant 0 : i32
    return %arg0, %c0_i32 : i32, i32
  }
  func.func @transform_1(%arg0: i32) -> (i32, i32) {
    %c0_i32 = arith.constant 0 : i32
    %c0_i32_0 = arith.constant 0 : i32
    return %arg0, %c0_i32 : i32, i32
  }
  func.func @transform_2(%arg0: i32) -> (i32, i32) {
    %c0_i32 = arith.constant 0 : i32
    %c0_i32_0 = arith.constant 0 : i32
    %c0_i32_1 = arith.constant 0 : i32
    return %c0_i32, %c0_i32_0 : i32, i32
  }
  func.func @transform_3(%arg0: i32) -> (i32, i32) {
    %c0_i32 = arith.constant 0 : i32
    %c0_i32_0 = arith.constant 0 : i32
    %c0_i32_1 = arith.constant 0 : i32
    return %c0_i32, %c0_i32_0 : i32, i32
  }
  func.func @transform_4(%arg0: i32) -> (i32, i32) {
    %c0_i32 = arith.constant 0 : i32
    %c0_i32_0 = arith.constant 0 : i32
    return %arg0, %c0_i32 : i32, i32
  }
}

</mosaic_0001>

<bundles_post_ra>
// kernel: tpu_custom_call.1
= control target key start
LH: loop header
LB: loop body
LE: loop exit
PB: predicated region body
PF: predicated region fallthrough
CT: control target
= control target key end

     0   :  { %9 = vsyncpa [#allocation3], 0  ;;  %s1105_s0 = inlined_call_operand.vmem [shape: f32[16,128], index: 0, kind: input, shape index: {}]   ;;  %s1106_s1 = inlined_call_operand.vmem [shape: f32[16,4], index: 1, kind: input, shape index: {}]   ;;  %s1107_s2 = inlined_call_operand.hbm [shape: f32[16,128], index: 2, kind: input, shape index: {}]   ;;  %s1108_s3 = inlined_call_operand.hbm [shape: f32[128,128], index: 3, kind: input, shape index: {}]   ;;  %s1109_s4 = inlined_call_operand.hbm [shape: f32[16,128], index: 4, kind: output, shape index: {}]  }
   0x1   :  { %10 = vsyncpa [#allocation6], 0 }
   0x2   :  { %11 = vsyncpa [#allocation4], 0 }
   0x3   :  { %13 = vsyncpa [#allocation4 + $0x1], 0  ;;  %s926_s15 = smov 0   ;;  %s928_s16 = smov 0  }
   0x4   :  { %s930_s17 = smov 0   ;;  %s932_s18 = smov 0  }
   0x5 LB: > { %s947_s19 = sadd.s32 4294967295, %s884_s18   ;;  %s581_s20 = sadd.s32 4294967294, %s884_s18   ;;  %s884_s18 = sphi %s932_s18, %s1127_s18   ;;  %s880_s17 = sphi %s930_s17, %s1126_s17   ;;  %s876_s16 = sphi %s928_s16, %s1125_s16   ;;  %s872_s15 = sphi %s926_s15, %s1124_s15  }
   0x6   : > { %s951_s21 = sadd.s32 1, %s884_s18   ;;  %s120_s22 = sadd.s32 1, %s880_s17 }
   0x7   : > { %s117_s23 = ssub.s32 %s884_s18, %s951_s21  ;;  %p130_p0 = scmp.ne.s32.totalorder %s880_s17, %s876_s16 }
   0x8   : > { %p118_p1 = scmp.eq.s32.totalorder %s117_s23, 0  ;;  %p131_p2 = scmp.eq.s32.totalorder %s947_s19, 1 }
   0x9   : > { %p136_p3 = scmp.ne.s32.totalorder %s876_s16, %s872_s15  ;;  %p137_p4 = scmp.eq.s32.totalorder %s581_s20, 1 }
   0xa   : > { %s962_s24 = scalar_select %p118_p1, %s880_s17, %s120_s22  }
   0xb   : > { %p964_p5 = por %p131_p2, %p130_p0  ;;  %p968_p6 = por %p137_p4, %p136_p3 }
   0xc   : > { %p582_p7 = scmp.ge.s32.totalorder %s884_s18, 1  ;;  %p144_p8 = scmp.lt.s32.totalorder %s884_s18, 3 }
   0xd   : > { %s1113_s25 = scalar_select %p964_p5, 1, 0 }
   0xe   : > { %s1114_s26 = scalar_select %p968_p6, 1, 0 }
   0xf   : > { %p1110_p9 = scmp.eq.s32.totalorder %s947_s19, 0  ;;  %p975_p10 = pnand %p582_p7, %p144_p8 }
  0x10   : > { %s886_s28 = smov [#allocation2]   ;;  %s887_s5 = smov [#allocation5]  }
  0x11   : > { %s1115_s27 = scalar_select %p975_p10, 1, 0 }
  0x12   : > { %s156_s29 = sshll.u32 %s886_s28, 4  ;;  %p682_p11 = pneg %p975_p10  ;;  %s157_s29 = int_to_ptr.vmem [resolvable:$true] %s156_s29 }
  0x13   : > { %s169_s6 = sshll.u32 %s887_s5, 4  ;;  %s758_s9 = scalar_lea.hbm %s1107_s2, 256  ;;  %s987_s6 = int_to_ptr.vmem [resolvable:$true] %s169_s6 }
  0x14   : > { %p983_p12 = pnand %p1110_p9, %p682_p11  ;;  %p759_p13 = scmp.ne.s32.totalorder %s1107_s2, %s758_s9 }
  0x15   : > { %p765_p3 = scmp.lt.u32.totalorder %s758_s9, %s1107_s2 }
  0x16   : > { %p760_p0 = pneg %p983_p12 }
  0x18   : > { %p761_p1 = pnand %p760_p0, %p759_p13 }
  0x1a   : > { %p762_p2 = pneg %p761_p1 }
  0x1c   : > { %p767_p4 = pnand %p765_p3, %p762_p2 }
  0x1e   : > { %770 = shalt.err (!%p767_p4)
}
  0x1f   : > { %s771_s14 = scalar_lea.vmem %s157_s29, 256  ;;  %p779_p9 = scmp.lt.s32.totalorder %s157_s29, %s157_s29 }
  0x20   : > { %p772_p7 = scmp.ne.s32.totalorder %s157_s29, %s771_s14  ;;  %p780_p6 = scmp.lt.s32.totalorder %s771_s14, %s771_s14 }
  0x22   : > { %p774_p8 = pnand %p772_p7, %p760_p0  ;;  %p781_p5 = por %p780_p6, %p779_p9 }
  0x24   : > { %p775_p11 = pneg %p774_p8 }
  0x26   : > { %p782_p10 = pnand %p781_p5, %p775_p11 }
  0x28   : > { %785 = shalt.err (!%p782_p10)
}
  0x29   : > { %s888_s20 = smov 128   ;;  %s889_s22 = smov 8  }
  0x2a   : > { %685 = dma.hbm_to_vmem [thread:$0]  (!%p983_p12), %s1107_s2, 256, %s157_s29, [#allocation3], %s888_s20, %s888_s20, %s889_s22  }
  0x2b   : > { %s786_s8 = scalar_lea.hbm %s1108_s3, 2048 }
  0x2c   : > { %p787_p13 = scmp.ne.s32.totalorder %s1108_s3, %s786_s8  ;;  %p793_p9 = scmp.lt.u32.totalorder %s786_s8, %s1108_s3 }
  0x2e   : > { %p789_p5 = pnand %p787_p13, %p760_p0 }
  0x30   : > { %p790_p6 = pneg %p789_p5 }
  0x32   : > { %p795_p10 = pnand %p793_p9, %p790_p6 }
  0x34   : > { %798 = shalt.err (!%p795_p10)
}
  0x35   : > { %s799_s29 = scalar_lea.vmem %s987_s6, 2048  ;;  %p807_p4 = scmp.lt.s32.totalorder %s987_s6, %s987_s6 }
  0x36   : > { %p800_p1 = scmp.ne.s32.totalorder %s987_s6, %s799_s29  ;;  %p808_p7 = scmp.lt.s32.totalorder %s799_s29, %s799_s29 }
  0x38   : > { %p802_p2 = pnand %p800_p1, %p760_p0  ;;  %p809_p8 = por %p808_p7, %p807_p4 }
  0x3a   : > { %p803_p3 = pneg %p802_p2 }
  0x3c   : > { %p810_p11 = pnand %p809_p8, %p803_p3 }
  0x3e   : > { %813 = shalt.err (!%p810_p11)
}
  0x3f   : > { %688 = dma.hbm_to_vmem [thread:$0]  (!%p983_p12), %s1108_s3, 2048, %s987_s6, [#allocation6], %s888_s20, %s888_s20, %s889_s22  }
  0x40   : > { %p1117_p13 = scmp.ne.s32.totalorder %s1115_s27, 0 }
  0x41   : > { %p1118_p5 = scmp.eq.s32.totalorder (!%p1117_p13), %s947_s19, 0 }
  0x42   : > { %199 = sbr.rel (%p1117_p13) target bundleno = 615 (0x267), region = 36 }
  0x49   : > { %859 = dma.done.wait (%p1118_p5), [#allocation3], 256   ;;  %p1119_p0 = pmov %p1118_p5 }
  0x4b   : > { %861 = vsyncadd (%p1119_p0), [#allocation3], 4294967040  ;;  %p1120_p6 = pmov %p1119_p0 }
  0x4c   : > { %p1121_p9 = pmov %p1119_p0 }
  0x4d   : > { %863 = dma.done.wait (%p1120_p6), [#allocation6], 2048  }
  0x4e   : > { %865 = vsyncadd (%p1121_p9), [#allocation6], 4294965248  ;;  %p232_p10 = scmp.lt.s32.totalorder %s947_s19, 1  ;;  %v890_v0 = vmov 0.0|0.0   ;;  %v246_v2 = vld [vmem:[#allocation5] sm:$0xff]  ;;  %v247_v3 = vld [vmem:[#allocation5 + $0x8] sm:$0xff]  ;;  %v349_v48 = vlaneseq }
  0x4f   : > { %648 = vmatprep.subr.bf16.mxu0 %v890_v0  ;;  %v248_v4 = vld [vmem:[#allocation5 + $0x10] sm:$0xff]  ;;  %v249_v5 = vld [vmem:[#allocation5 + $0x18] sm:$0xff]  ;;  %v649_v6 = vpack.c.bf16 %v247_v3, %v246_v2  ;;  %v250_v8 = vld [vmem:[#allocation5 + $0x20] sm:$0xff]  ;;  %s891_s7 = smov 126   ;;  %vm892_vm0 = vmmov 0   ;;  %v893_v25 = vmov 0.0  }
  0x50   : > { %s233_s30 = scalar_select %p232_p10, %s947_s19, 1  ;;  %v652_v7 = vpack.c.bf16 %v249_v5, %v248_v4  ;;  %v251_v9 = vld [vmem:[#allocation5 + $0x28] sm:$0xff]  ;;  %v252_v11 = vld [vmem:[#allocation5 + $0x30] sm:$0xff]  ;;  %v253_v12 = vld [vmem:[#allocation5 + $0x38] sm:$0xff]  ;;  %645 = vmatprep.mubr.msk.f32.mxu0 %vm892_vm0, %v893_v25  ;;  %v894_v29 = vmov 0   ;;  %v895_v30 = vmov 1  }
  0x51   : > { %650 = vmatpush3.bf16.msra.mxu0 %v649_v6  ;;  %v655_v10 = vpack.c.bf16 %v251_v9, %v250_v8  ;;  %v658_v13 = vpack.c.bf16 %v253_v12, %v252_v11  ;;  %v254_v14 = vld [vmem:[#allocation5 + $0x40] sm:$0xff]  ;;  %v255_v15 = vld [vmem:[#allocation5 + $0x48] sm:$0xff]  ;;  %v256_v18 = vld [vmem:[#allocation5 + $0x50] sm:$0xff]  ;;  %744 = vset.pattern.permute.xlu1 %v894_v29  ;;  %s896_s8 = smov 127   ;;  %v897_v39 = vmov 127   ;;  %v898_v42 = vmov 2  }
  0x52   : > { %s590_s27 = sshll.u32 %s233_s30, 3  ;;  %651 = vmatprep.subr.bf16.mxu0 %v890_v0  ;;  %v661_v17 = vpack.c.bf16 %v255_v15, %v254_v14  ;;  %v257_v19 = vld [vmem:[#allocation5 + $0x58] sm:$0xff]  ;;  %v258_v22 = vld [vmem:[#allocation5 + $0x60] sm:$0xff]  ;;  %v259_v23 = vld [vmem:[#allocation5 + $0x68] sm:$0xff]  ;;  %747 = vset.pattern.permute.xlu0 %v895_v30  ;;  %v899_v43 = vmov 3   ;;  %v350_v50 = vshrl.u32 %v349_v48, 7 }
  0x53   : > { %s235_s22 = scalar_lea.vmem %s1105_s0, %s590_s27  ;;  %s239_s5 = scalar_lea.vmem %s1106_s1, %s590_s27  ;;  %v664_v21 = vpack.c.bf16 %v257_v19, %v256_v18  ;;  %v667_v24 = vpack.c.bf16 %v259_v23, %v258_v22  ;;  %v260_v26 = vld [vmem:[#allocation5 + $0x70] sm:$0xff]  ;;  %v261_v27 = vld [vmem:[#allocation5 + $0x78] sm:$0xff] }
  0x54   : > { %v240_v1 = vld [vmem:[%s235_s22] sm:$0xff]  ;;  %v670_v28 = vpack.c.bf16 %v261_v27, %v260_v26  ;;  %v408_v52 = vsub.s32 6, %v350_v50  ;;  %v418_v53 = vsub.s32 4, %v350_v50  ;;  %v429_v54 = vsub.s32 7, %v350_v50  ;;  %v343_v3 = vld [vmem:[#allocation2 + $0x8] sm:$0xff]  ;;  %s229_s9 = sand.u32 1, %s876_s16  }
  0x55   : > { %241 = vmax.xlane.f32.xlu0 %v240_v1  ;;  %653 = vmatpush3.bf16.msra.mxu0 %v652_v7  ;;  %v341_v16 = vld [vmem:[%s239_s5] sm:$0xff]  ;;  %v438_v55 = vsub.s32 5, %v350_v50  ;;  %v351_v2 = vsub.s32 0, %v350_v50  ;;  %v361_v14 = vsub.s32 1, %v350_v50  ;;  %s589_s10 = sshll.u32 %s229_s9, 3  ;;  %s593_s11 = sshll.u32 %s947_s19, 7 }
  0x56   : > { %654 = vmatprep.subr.bf16.mxu0 %v890_v0  ;;  %v388_v20 = vmul.f32 0.5, %v341_v16  ;;  %v342_v56 = vld [vmem:[#allocation2] sm:$0xff]  ;;  %s231_s12 = scalar_lea.vmem [#allocation7], %s589_s10  ;;  %s1063_s30 = scalar_lea.hbm %s1109_s4, %s593_s11 }
  0x57   : > { %v409_v57 = vrot.slane %v342_v56, %v408_v52  ;;  %v419_v58 = vrot.slane %v342_v56, %v418_v53  ;;  %v430_v59 = vrot.slane %v342_v56, %v429_v54  ;;  %v439_v60 = vrot.slane %v342_v56, %v438_v55  ;;  %s488_s29 = sshll.u32 %s231_s12, 4  ;;  %s475_s27 = scalar_lea.sflag [#allocation4], %s229_s9  ;;  %s1065_s29 = int_to_ptr.vmem [resolvable:$true] %s488_s29 }
  0x58   : > { %v452_v6 = vrot.slane %v343_v3, %v351_v2  ;;  %v362_v22 = vrot.slane %v342_v56, %v361_v14  ;;  %s814_s6 = scalar_lea.vmem %s1065_s29, 128  ;;  %p1122_p1 = scmp.ne.s32.totalorder %s1113_s25, 0 }
  0x59   : > { %656 = vmatpush3.bf16.msra.mxu0 %v655_v10  ;;  %p815_p12 = scmp.ne.s32.totalorder %s1065_s29, %s814_s6  ;;  %s900_s19 = smov [#allocation7]  }
  0x5a   : > { %657 = vmatprep.subr.bf16.mxu0 %v890_v0  ;;  %s818_s20 = sshll.u32 %s900_s19, 4  ;;  %s819_s20 = int_to_ptr.vmem [resolvable:$false] %s818_s20 }
  0x5b   : > { %p816_p2 = pnand %p815_p12, %p1122_p1  ;;  %s820_s22 = scalar_lea.vmem %s819_s20, 256 }
  0x5c   : > { %p821_p4 = scmp.lt.s32.totalorder %s1065_s29, %s819_s20  ;;  %p822_p7 = scmp.lt.s32.totalorder %s820_s22, %s814_s6 }
  0x5d   : > { %659 = vmatpush3.bf16.msra.mxu0 %v658_v13  ;;  %p817_p3 = pneg %p816_p2 }
  0x5e   : > { %660 = vmatprep.subr.bf16.mxu0 %v890_v0  ;;  %p823_p8 = por %p822_p7, %p821_p4 }
  0x60   : > { %p824_p11 = pnand %p823_p8, %p817_p3 }
  0x61   : > { %662 = vmatpush3.bf16.msra.mxu0 %v661_v17 }
  0x62   : > { %663 = vmatprep.subr.bf16.mxu0 %v890_v0 }
  0x65   : > { %665 = vmatpush3.bf16.msra.mxu0 %v664_v21  ;;  %v372_v21 = vsub.s32 2, %v350_v50 }
  0x66   : > { %666 = vmatprep.subr.bf16.mxu0 %v890_v0 }
  0x69   : > { %668 = vmatpush3.bf16.msra.mxu0 %v667_v24 }
  0x6a   : > { %669 = vmatprep.subr.bf16.mxu0 %v890_v0 }
  0x6b   : > { %390 = vrot.lane.b32.xlu0 %v388_v20, %s891_s7  ;;  %v352_v20 = vrot.slane %v342_v56, %v351_v2 }
  0x6d   : > { %671 = vmatpush3.bf16.msra.mxu0 %v670_v28  ;;  %v373_v28 = vrot.slane %v342_v56, %v372_v21 }
  0x6f   : > { %356 = vperm.xlu0 %747, %v341_v16  }
  0x73   : > { %750 = vset.pattern.permute.xlu0 %v897_v39 }
  0xe2   : > { %v242_v31 = vpop.xlane.xlu0 %241 }
  0xe3   : > { %v243_v32 = vsub.f32 %v240_v1, %v242_v31 }
  0xe5   : > { %v244_v33 = vmul.f32 1.442695, %v243_v32 }
  0xe6   : > { %v391_v34 = vpop.permute.xlu0 %390 }
  0xe7   : > { %752 = vpow2.f32 %v244_v33  ;;  %v393_v35 = vsub.f32 %v341_v16, %v391_v34  ;;  %v394_v36 = vadd.f32 %v391_v34, %v341_v16 }
  0xe9   : > { %v395_v37 = vsub.f32 %v394_v36, %v393_v35 }
  0xeb   : > { %397 = vrot.lane.b32.xlu1 %v395_v37, %s896_s8 }
  0xee   : > { %v357_v24 = vpop.permute.xlu0 %356 }
  0xef   : > { %403 = vperm.xlu1 %744, %v394_v36  }
  0xf1   : > { %v753_v38 = vpop.eup %752 }
  0xf2   : > { %646 = vmatmul.mubr.f32.vlgmr.msra.gmra.mrb[0].mxu0 %v753_v38 }
  0xf3   : > { %413 = vperm.xlu1 %744, %v393_v35  }
  0xf7   : > { %745 = vset.pattern.permute.xlu1 %v895_v30  ;;  %v383_v30 = vsub.s32 3, %v350_v50 }
  0xf8   : > { %424 = vperm.xlu1 %745, %v394_v36  }
  0xfc   : > { %433 = vperm.xlu1 %745, %v393_v35   ;;  %v384_v35 = vrot.slane %v342_v56, %v383_v30 }
 0x100   : > { %746 = vset.pattern.permute.xlu1 %v894_v29 }
 0x15d   : > { %v398_v40 = vpop.permute.xlu1 %397 }
 0x15e   : > { %v400_v41 = vmul.f32 %v398_v40, %v395_v37 }
 0x160   : > { %446 = vperm.xlu1 %746, %v400_v41  }
 0x164   : > { %346 = vperm.xlu1 %746, %v341_v16  }
 0x168   : > { %748 = vset.pattern.permute.xlu1 %v898_v42 }
 0x169   : > { %367 = vperm.xlu1 %748, %v341_v16  }
 0x16d   : > { %749 = vset.pattern.permute.xlu1 %v899_v43 }
 0x16e   : > { %378 = vperm.xlu1 %749, %v341_v16   ;;  %v404_v47 = vpop.permute.xlu1 %403 }
 0x16f   : > { %v410_v62 = vmin.f32 %v404_v47, %v409_v57  ;;  %v455_v8 = vmax.f32 %v404_v47, %v409_v57 }
 0x172   : > { %v414_v49 = vpop.permute.xlu1 %413 }
 0x173   : > { %v420_v63 = vmax.f32 %v414_v49, %v419_v58  ;;  %v456_v9 = vmin.f32 %v414_v49, %v419_v58 }
 0x175   : > { %v421_v4 = vsub.f32 %v410_v62, %v420_v63  ;;  %v457_v17 = vsub.f32 %v455_v8, %v456_v9 }
 0x177   : > { %v425_v51 = vpop.permute.xlu1 %424  ;;  %v422_v10 = vmax.f32 %v421_v4, 0.0 }
 0x178   : > { %v431_v0 = vmin.f32 %v425_v51, %v430_v59  ;;  %v458_v11 = vmax.f32 %v425_v51, %v430_v59 }
 0x17b   : > { %v434_v61 = vpop.permute.xlu1 %433 }
 0x17c   : > { %v440_v1 = vmax.f32 %v434_v61, %v439_v60  ;;  %v459_v13 = vmin.f32 %v434_v61, %v439_v60 }
 0x17e   : > { %v441_v5 = vsub.f32 %v431_v0, %v440_v1  ;;  %v460_v18 = vsub.f32 %v458_v11, %v459_v13 }
 0x180   : > { %v442_v12 = vmax.f32 %v441_v5, 0.0  ;;  %v461_v25 = vmul.f32 %v460_v18, %v457_v17 }
 0x182   : > { %v443_v19 = vmul.f32 %v442_v12, %v422_v10 }
 0x1c5   : > { %v1054_v44 = vpop.f32.mrb[0].mxu0 }
 0x1c6   : > { %754 = vrcp.f32 %v1054_v44  ;;  %v647_v45 = vpop.f32.mrb[1].mxu0 }
 0x1c7   : > { %v462_v45 = vmul.f32 %v461_v25, %v443_v19 }
 0x1d0   : > { %v755_v46 = vpop.eup %754 }
 0x1d1   : > { %336 = vperm.xlu0 %750, %v755_v46  }
 0x1d5   : > { %751 = vset.pattern.permute.xlu0 %v894_v29  ;;  %v363_v29 = vsub.f32 %v357_v24, %v362_v22 }
 0x1d7   : > { %v364_v34 = vand.u32 2147483647, %v363_v29 }
 0x1df   : > { %v447_v7 = vpop.permute.xlu1 %446 }
 0x1e0   : > { %v453_v15 = vadd.f32 %v452_v6, %v447_v7 }
 0x1e2   : > { %v454_v23 = vsub.f32 %v453_v15, %v443_v19 }
 0x1e3   : > { %v347_v16 = vpop.permute.xlu1 %346 }
 0x1e4   : > { %v353_v27 = vsub.f32 %v347_v16, %v352_v20  ;;  %v466_v31 = vmul.f32 %v461_v25, %v454_v23  ;;  %v463_v37 = vsub.f32 %v461_v25, %v454_v23 }
 0x1e6   : > { %v354_v32 = vand.u32 2147483647, %v353_v27  ;;  %756 = vrcp.f32 %v466_v31  ;;  %v464_v41 = vmul.f32 %v463_v37, %v454_v23 }
 0x1e8   : > { %v368_v26 = vpop.permute.xlu1 %367  ;;  %v365_v39 = vadd.f32 %v364_v34, %v354_v32  ;;  %v465_v47 = vsub.f32 %v462_v45, %v464_v41 }
 0x1e9   : > { %v374_v33 = vsub.f32 %v368_v26, %v373_v28 }
 0x1eb   : > { %v375_v38 = vand.u32 2147483647, %v374_v33 }
 0x1ed   : > { %v379_v36 = vpop.permute.xlu1 %378  ;;  %v376_v42 = vadd.f32 %v375_v38, %v365_v39 }
 0x1ee   : > { %v385_v40 = vsub.f32 %v379_v36, %v384_v35 }
 0x1f0   : > { %v386_v43 = vand.u32 2147483647, %v385_v40  ;;  %v757_v46 = vpop.eup %756 }
 0x1f1   : > { %v468_v50 = vmul.f32 %v757_v46, %v465_v47 }
 0x1f2   : > { %v387_v48 = vadd.f32 %v386_v43, %v376_v42 }
 0x1f3   : > { %v471_v54 = vmul.f32 2.0, %v468_v50 }
 0x1f4   : > { %v469_v52 = vmul.f32 5.0, %v387_v48 }
 0x250   : > { %v337_v49 = vpop.permute.xlu0 %336 }
 0x251   : > { %v339_v51 = vmul.f32 %v337_v49, %v1054_v44 }
 0x253   : > { %v340_v53 = vsub.f32 0.0, %v339_v51 }
 0x255   : > { %v470_v55 = vadd.f32 %v469_v52, %v340_v53 }
 0x257   : > { %v472_v56 = vsub.f32 %v470_v55, %v471_v54 }
 0x259   : > { %473 = vst [vmem:[%s231_s12] sm:$0xff] %v472_v56 }
 0x25a   : > { %827 = shalt.err (!%p824_p11)
}
 0x25b   : > { %s828_s23 = scalar_lea.hbm %s1063_s30, 128  ;;  %s832_s7 = scalar_lea.hbm %s1109_s4, 256 }
 0x25c   : > { %p829_p13 = scmp.ne.s32.totalorder %s1063_s30, %s828_s23  ;;  %p833_p6 = scmp.lt.u32.totalorder %s1063_s30, %s1109_s4 }
 0x25d   : > { %p834_p9 = scmp.lt.u32.totalorder %s832_s7, %s828_s23  ;;  %p836_p12 = scmp.lt.u32.totalorder %s828_s23, %s1063_s30 }
 0x25e   : > { %p830_p5 = pnand %p829_p13, %p1122_p1 }
 0x25f   : > { %p835_p10 = por %p834_p9, %p833_p6 }
 0x260   : > { %p831_p0 = pneg %p830_p5 }
 0x261   : > { %p837_p2 = por %p836_p12, %p835_p10 }
 0x263   : > { %p838_p3 = pnand %p837_p2, %p831_p0 }
 0x265   : > { %841 = shalt.err (!%p838_p3)
}
 0x266   : > { %680 = dma.vmem_to_hbm [thread:$0]  (%p1122_p1), %s1065_s29, 128, %s1063_s30, %s475_s27  }
 0x267 PF: > { %p697_p4 = scmp.ge.s32.totalorder %s884_s18, 2  ;;  %s500_s10 = sand.u32 1, %s872_s15  }
 0x268   : > { %p1123_p7 = scmp.ne.s32.totalorder %s1114_s26, 0  ;;  %s501_s11 = scalar_lea.sflag [#allocation4], %s500_s10 }
 0x26a   : > { %p690_p8 = pnand %p697_p4, %p1123_p7 }
 0x26c   : > { %867 = dma.done.wait (!%p690_p8), %s501_s11, 128  }
 0x26d   : > { %869 = vsyncadd (!%p690_p8), %s501_s11, 4294967168  ;;  %p16_p11 = scmp.ge.s32.totalorder %s951_s21, 4   ;;  %s1124_s15 = smov %s876_s16 }
 0x26e   : > { %s1125_s16 = smov %s880_s17  ;;  %s1126_s17 = smov %s962_s24 }
 0x26f   : > { %s1127_s18 = smov %s951_s21  ;;  %18 = sbr.rel (!%p16_p11) target bundleno = 5 (0x5), region = 83 }
 0x276   :  { %506 = vsyncpa [#allocation3], 1 }
 0x277   :  { %508 = vsyncpa [#allocation3 + $0x1], 1 }
 0x278   :  { %509 = vsyncpa [#allocation6], 1 }
 0x279   :  { %510 = vsyncpa [#allocation4], 1 }
 0x27a   :  { %512 = vsyncpa [#allocation4 + $0x1], 1 }

</bundles_post_ra>
